<compile_context>
chip_gen: v7x
topology: tpu7x:2x2x1
jax: 0.10.0
libtpu: 0.0.40
codegen_flags: <defaults>
</compile_context>

<pallas_src>
import jax
import jax.numpy as jnp
from jax.experimental import pallas as pl
from jax.experimental.pallas import tpu as pltpu


def _mlp_kernel(x_ref,
                w1_ref, b1_ref,
                w2_ref, b2_ref,
                w3_ref, b3_ref,
                w4_ref, b4_ref,
                o_ref):
    # bf16 operands into the MXU, f32 accumulation; bias + ReLU in f32, then recast for next dot.
    h = jnp.dot(x_ref[...], w1_ref[...], preferred_element_type=jnp.float32) + b1_ref[...]
    h = jnp.maximum(h, 0.0).astype(jnp.bfloat16)

    h = jnp.dot(h, w2_ref[...], preferred_element_type=jnp.float32) + b2_ref[...]
    h = jnp.maximum(h, 0.0).astype(jnp.bfloat16)

    h = jnp.dot(h, w3_ref[...], preferred_element_type=jnp.float32) + b3_ref[...]
    h = jnp.maximum(h, 0.0).astype(jnp.bfloat16)

    h = jnp.dot(h, w4_ref[...], preferred_element_type=jnp.float32) + b4_ref[...]
    o_ref[...] = h.astype(o_ref.dtype)


def _resident_spec(shape):
    # Whole-array block, same block index at every grid step -> stays VMEM-resident.
    return pl.BlockSpec(shape, lambda i: (0,) * len(shape))


def _round_up(a, b):
    return ((a + b - 1) // b) * b


def net_forward(x, params, tile_n=4096):
    """Forward pass of Net. x: any shape flattening to (-1, 33)."""
    x2d = x.reshape(-1, 33)
    n = x2d.shape[0]
    x2d = x2d.astype(jnp.bfloat16)

    (w1, b1), (w2, b2), (w3, b3), (w4, b4) = params
    w1, w2, w3, w4 = (w.astype(jnp.bfloat16) for w in (w1, w2, w3, w4))
    b1, b2, b3, b4 = (b.astype(jnp.float32) for b in (b1, b2, b3, b4))

    # Batch tile: multiple of 8 (sublane), capped at tile_n (VMEM budget: v7x 64 MiB physical,
    # v5e 16 MiB default scoped), and small enough that the grid has >= 2 steps when n > 8 so
    # both v7x TensorCores get work.
    tile = min(int(tile_n), max(8, _round_up(pl.cdiv(n, 2), 8)))
    grid = (pl.cdiv(n, tile),)

    # VMEM budget (lane-padded): x double buffer (bf16, 33->128 lanes), out double buffer
    # (f32, 2->128 lanes), f32 intermediates h1..h3 + temps; 2x slack + weights/misc margin.
    lane = 128
    vmem_bytes = 2 * (2 * tile * lane * 2          # x: 2 bufs, bf16
                      + 2 * tile * lane * 4        # out: 2 bufs, f32
                      + 4 * tile * lane * 4)       # intermediates/temps, f32
    vmem_bytes = int(min(max(vmem_bytes + (4 << 20), 24 << 20), 56 << 20))

    in_specs = [
        pl.BlockSpec((tile, 33), lambda i: (i, 0)),   # x streamed over batch (double-buffered)
        _resident_spec(w1.shape), _resident_spec(b1.shape),
        _resident_spec(w2.shape), _resident_spec(b2.shape),
        _resident_spec(w3.shape), _resident_spec(b3.shape),
        _resident_spec(w4.shape), _resident_spec(b4.shape),
    ]
    out_spec = pl.BlockSpec((tile, 2), lambda i: (i, 0))

    # No pre-padding of x: ragged last block is handled by Pallas (OOB output rows masked).
    out = pl.pallas_call(
        _mlp_kernel,
        out_shape=jax.ShapeDtypeStruct((n, 2), jnp.float32),
        grid=grid,
        in_specs=in_specs,
        out_specs=out_spec,
        compiler_params=pltpu.CompilerParams(
            dimension_semantics=("parallel",),
            vmem_limit_bytes=vmem_bytes,
        ),
    )(x2d, w1, b1, w2, b2, w3, b3, w4, b4)
    return out


def init_params(key):
    """Deterministic init mimicking torch.nn.Linear default (uniform +/- 1/sqrt(fan_in)).
    Weights stored as (in_features, out_features) so the kernel computes x @ W + b."""
    dims = [(33, 128), (128, 64), (64, 32), (32, 2)]
    params = []
    for fan_in, fan_out in dims:
        key, kw, kb = jax.random.split(key, 3)
        bound = 1.0 / jnp.sqrt(float(fan_in))
        w = jax.random.uniform(kw, (fan_in, fan_out), jnp.float32, -bound, bound)
        b = jax.random.uniform(kb, (1, fan_out), jnp.float32, -bound, bound)
        params.append((w, b))
    return params


def net_forward_ref_f32(x, params):
    """Pure-JAX f32 reference (the original module's semantics)."""
    h = x.reshape(-1, 33).astype(jnp.float32)
    (w1, b1), (w2, b2), (w3, b3), (w4, b4) = params
    h = jnp.maximum(h @ w1 + b1, 0.0)
    h = jnp.maximum(h @ w2 + b2, 0.0)
    h = jnp.maximum(h @ w3 + b3, 0.0)
    return h @ w4 + b4


def net_forward_ref_bf16(x, params):
    """Pure-JAX reference mimicking the kernel's numerics (bf16 operands, f32 accumulation)."""
    h = x.reshape(-1, 33).astype(jnp.bfloat16)
    for i, (w, b) in enumerate(params):
        h = jnp.dot(h, w.astype(jnp.bfloat16),
                    preferred_element_type=jnp.float32) + b.astype(jnp.float32)
        if i < 3:
            h = jnp.maximum(h, 0.0).astype(jnp.bfloat16)
    return h


if __name__ == "__main__":
    key = jax.random.PRNGKey(0)
    k_params, k_x = jax.random.split(key)
    params = init_params(k_params)

    # Small test consistent with the module: batch=8 rows of 33 features.
    x = jax.random.normal(k_x, (8, 33), dtype=jnp.float32)
    out = jax.block_until_ready(net_forward(x, params))
    assert out.shape == (8, 2), out.shape
    assert jnp.allclose(out, net_forward_ref_bf16(x, params), atol=1e-2, rtol=1e-2), \
        "mismatch vs bf16 reference (small)"
    assert jnp.allclose(out, net_forward_ref_f32(x, params), atol=6e-2, rtol=6e-2), \
        "mismatch vs f32 reference (small)"

    # Larger batch, non-multiple of the tile: exercises multi-step grid + ragged last block.
    x_big = jax.random.normal(jax.random.fold_in(k_x, 1), (2000, 33), dtype=jnp.float32)
    out_big = jax.block_until_ready(net_forward(x_big, params, tile_n=768))
    assert out_big.shape == (2000, 2), out_big.shape
    assert jnp.allclose(out_big, net_forward_ref_bf16(x_big, params), atol=1e-2, rtol=1e-2), \
        "mismatch vs bf16 reference (big)"
    assert jnp.allclose(out_big, net_forward_ref_f32(x_big, params), atol=6e-2, rtol=6e-2), \
        "mismatch vs f32 reference (big)"

    print("KERNEL_OK")
</pallas_src>

<mosaic_0001>
module attributes {stable_mosaic.version = 11 : i64} {
  func.func @_mlp_kernel(%arg0: i32, %arg1: memref<8x33xbf16, #tpu.memory_space<vmem>>, %arg2: memref<33x128xbf16, #tpu.memory_space<vmem>>, %arg3: memref<1x128xf32, #tpu.memory_space<vmem>>, %arg4: memref<128x64xbf16, #tpu.memory_space<vmem>>, %arg5: memref<1x64xf32, #tpu.memory_space<vmem>>, %arg6: memref<64x32xbf16, #tpu.memory_space<vmem>>, %arg7: memref<1x32xf32, #tpu.memory_space<vmem>>, %arg8: memref<32x2xbf16, #tpu.memory_space<vmem>>, %arg9: memref<1x2xf32, #tpu.memory_space<vmem>>, %arg10: memref<8x2xf32, #tpu.memory_space<vmem>>) attributes {dimension_semantics = [#tpu.dimension_semantics<parallel>], iteration_bounds = array<i64: 1>, scalar_prefetch = 0 : i64, scratch_operands = 0 : i64, tpu.core_type = #tpu.core_type<tc>, window_params = [{transform_indices = @transform_0, window_bounds = array<i64: 8, 33>}, {pipeline_mode = #tpu.pipeline_mode<synchronous>, transform_indices = @transform_1, window_bounds = array<i64: 33, 128>}, {pipeline_mode = #tpu.pipeline_mode<synchronous>, transform_indices = @transform_2, window_bounds = array<i64: 1, 128>}, {pipeline_mode = #tpu.pipeline_mode<synchronous>, transform_indices = @transform_3, window_bounds = array<i64: 128, 64>}, {pipeline_mode = #tpu.pipeline_mode<synchronous>, transform_indices = @transform_4, window_bounds = array<i64: 1, 64>}, {pipeline_mode = #tpu.pipeline_mode<synchronous>, transform_indices = @transform_5, window_bounds = array<i64: 64, 32>}, {pipeline_mode = #tpu.pipeline_mode<synchronous>, transform_indices = @transform_6, window_bounds = array<i64: 1, 32>}, {pipeline_mode = #tpu.pipeline_mode<synchronous>, transform_indices = @transform_7, window_bounds = array<i64: 32, 2>}, {pipeline_mode = #tpu.pipeline_mode<synchronous>, transform_indices = @transform_8, window_bounds = array<i64: 1, 2>}, {transform_indices = @transform_9, window_bounds = array<i64: 8, 2>}]} {
    %c0 = arith.constant 0 : index
    %c0_0 = arith.constant 0 : index
    %0 = vector.load %arg1[%c0, %c0_0] : memref<8x33xbf16, #tpu.memory_space<vmem>>, vector<8x33xbf16>
    %c0_1 = arith.constant 0 : index
    %c0_2 = arith.constant 0 : index
    %1 = vector.load %arg2[%c0_1, %c0_2] : memref<33x128xbf16, #tpu.memory_space<vmem>>, vector<33x128xbf16>
    %cst = arith.constant dense<0.000000e+00> : vector<8x128xf32>
    %2 = tpu.matmul %0, %1, %cst {dimension_numbers = #tpu.dot_dimension_numbers<[1], [0], [0], [1], [0, 0, 1, 1], [], []>} : vector<8x33xbf16>, vector<33x128xbf16>, vector<8x128xf32> -> vector<8x128xf32>
    %c0_3 = arith.constant 0 : index
    %c0_4 = arith.constant 0 : index
    %3 = vector.load %arg3[%c0_3, %c0_4] : memref<1x128xf32, #tpu.memory_space<vmem>>, vector<1x128xf32>
    %4 = vector.broadcast %3 : vector<1x128xf32> to vector<8x128xf32>
    %5 = arith.addf %2, %4 : vector<8x128xf32>
    %cst_5 = arith.constant 0.000000e+00 : f32
    %6 = vector.broadcast %cst_5 : f32 to vector<8x128xf32>
    %7 = arith.maximumf %5, %6 : vector<8x128xf32>
    %8 = arith.truncf %7 : vector<8x128xf32> to vector<8x128xbf16>
    %c0_6 = arith.constant 0 : index
    %c0_7 = arith.constant 0 : index
    %9 = vector.load %arg4[%c0_6, %c0_7] : memref<128x64xbf16, #tpu.memory_space<vmem>>, vector<128x64xbf16>
    %cst_8 = arith.constant dense<0.000000e+00> : vector<8x64xf32>
    %10 = tpu.matmul %8, %9, %cst_8 {dimension_numbers = #tpu.dot_dimension_numbers<[1], [0], [0], [1], [0, 0, 1, 1], [], []>} : vector<8x128xbf16>, vector<128x64xbf16>, vector<8x64xf32> -> vector<8x64xf32>
    %c0_9 = arith.constant 0 : index
    %c0_10 = arith.constant 0 : index
    %11 = vector.load %arg5[%c0_9, %c0_10] : memref<1x64xf32, #tpu.memory_space<vmem>>, vector<1x64xf32>
    %12 = vector.broadcast %11 : vector<1x64xf32> to vector<8x64xf32>
    %13 = arith.addf %10, %12 : vector<8x64xf32>
    %cst_11 = arith.constant 0.000000e+00 : f32
    %14 = vector.broadcast %cst_11 : f32 to vector<8x64xf32>
    %15 = arith.maximumf %13, %14 : vector<8x64xf32>
    %16 = arith.truncf %15 : vector<8x64xf32> to vector<8x64xbf16>
    %c0_12 = arith.constant 0 : index
    %c0_13 = arith.constant 0 : index
    %17 = vector.load %arg6[%c0_12, %c0_13] : memref<64x32xbf16, #tpu.memory_space<vmem>>, vector<64x32xbf16>
    %cst_14 = arith.constant dense<0.000000e+00> : vector<8x32xf32>
    %18 = tpu.matmul %16, %17, %cst_14 {dimension_numbers = #tpu.dot_dimension_numbers<[1], [0], [0], [1], [0, 0, 1, 1], [], []>} : vector<8x64xbf16>, vector<64x32xbf16>, vector<8x32xf32> -> vector<8x32xf32>
    %c0_15 = arith.constant 0 : index
    %c0_16 = arith.constant 0 : index
    %19 = vector.load %arg7[%c0_15, %c0_16] : memref<1x32xf32, #tpu.memory_space<vmem>>, vector<1x32xf32>
    %20 = vector.broadcast %19 : vector<1x32xf32> to vector<8x32xf32>
    %21 = arith.addf %18, %20 : vector<8x32xf32>
    %cst_17 = arith.constant 0.000000e+00 : f32
    %22 = vector.broadcast %cst_17 : f32 to vector<8x32xf32>
    %23 = arith.maximumf %21, %22 : vector<8x32xf32>
    %24 = arith.truncf %23 : vector<8x32xf32> to vector<8x32xbf16>
    %c0_18 = arith.constant 0 : index
    %c0_19 = arith.constant 0 : index
    %25 = vector.load %arg8[%c0_18, %c0_19] : memref<32x2xbf16, #tpu.memory_space<vmem>>, vector<32x2xbf16>
    %cst_20 = arith.constant dense<0.000000e+00> : vector<8x2xf32>
    %26 = tpu.matmul %24, %25, %cst_20 {dimension_numbers = #tpu.dot_dimension_numbers<[1], [0], [0], [1], [0, 0, 1, 1], [], []>} : vector<8x32xbf16>, vector<32x2xbf16>, vector<8x2xf32> -> vector<8x2xf32>
    %c0_21 = arith.constant 0 : index
    %c0_22 = arith.constant 0 : index
    %27 = vector.load %arg9[%c0_21, %c0_22] : memref<1x2xf32, #tpu.memory_space<vmem>>, vector<1x2xf32>
    %28 = vector.broadcast %27 : vector<1x2xf32> to vector<8x2xf32>
    %29 = arith.addf %26, %28 : vector<8x2xf32>
    %c0_23 = arith.constant 0 : index
    %c0_24 = arith.constant 0 : index
    %30 = vector.load %arg10[%c0_23, %c0_24] : memref<8x2xf32, #tpu.memory_space<vmem>>, vector<8x2xf32>
    tpu.vector_store %arg10[%c0_23, %c0_24], %29 {strides = array<i32>} : memref<8x2xf32, #tpu.memory_space<vmem>>, vector<8x2xf32>,
    return
  }
  func.func @transform_0(%arg0: i32) -> (i32, i32) {
    %c0_i32 = arith.constant 0 : i32
    %c0_i32_0 = arith.constant 0 : i32
    return %arg0, %c0_i32 : i32, i32
  }
  func.func @transform_1(%arg0: i32) -> (i32, i32) {
    %c0_i32 = arith.constant 0 : i32
    %c0_i32_0 = arith.constant 0 : i32
    %c0_i32_1 = arith.constant 0 : i32
    return %c0_i32, %c0_i32_0 : i32, i32
  }
  func.func @transform_2(%arg0: i32) -> (i32, i32) {
    %c0_i32 = arith.constant 0 : i32
    %c0_i32_0 = arith.constant 0 : i32
    %c0_i32_1 = arith.constant 0 : i32
    return %c0_i32, %c0_i32_0 : i32, i32
  }
  func.func @transform_3(%arg0: i32) -> (i32, i32) {
    %c0_i32 = arith.constant 0 : i32
    %c0_i32_0 = arith.constant 0 : i32
    %c0_i32_1 = arith.constant 0 : i32
    return %c0_i32, %c0_i32_0 : i32, i32
  }
  func.func @transform_4(%arg0: i32) -> (i32, i32) {
    %c0_i32 = arith.constant 0 : i32
    %c0_i32_0 = arith.constant 0 : i32
    %c0_i32_1 = arith.constant 0 : i32
    return %c0_i32, %c0_i32_0 : i32, i32
  }
  func.func @transform_5(%arg0: i32) -> (i32, i32) {
    %c0_i32 = arith.constant 0 : i32
    %c0_i32_0 = arith.constant 0 : i32
    %c0_i32_1 = arith.constant 0 : i32
    return %c0_i32, %c0_i32_0 : i32, i32
  }
  func.func @transform_6(%arg0: i32) -> (i32, i32) {
    %c0_i32 = arith.constant 0 : i32
    %c0_i32_0 = arith.constant 0 : i32
    %c0_i32_1 = arith.constant 0 : i32
    return %c0_i32, %c0_i32_0 : i32, i32
  }
  func.func @transform_7(%arg0: i32) -> (i32, i32) {
    %c0_i32 = arith.constant 0 : i32
    %c0_i32_0 = arith.constant 0 : i32
    %c0_i32_1 = arith.constant 0 : i32
    return %c0_i32, %c0_i32_0 : i32, i32
  }
  func.func @transform_8(%arg0: i32) -> (i32, i32) {
    %c0_i32 = arith.constant 0 : i32
    %c0_i32_0 = arith.constant 0 : i32
    %c0_i32_1 = arith.constant 0 : i32
    return %c0_i32, %c0_i32_0 : i32, i32
  }
  func.func @transform_9(%arg0: i32) -> (i32, i32) {
    %c0_i32 = arith.constant 0 : i32
    %c0_i32_0 = arith.constant 0 : i32
    return %arg0, %c0_i32 : i32, i32
  }
}

</mosaic_0001>

<bundles_post_ra>
// kernel: tpu_custom_call.1
= control target key start
LH: loop header
LB: loop body
LE: loop exit
PB: predicated region body
PF: predicated region fallthrough
CT: control target
= control target key end

     0   :  { %vm65_vm0 = vcmask 1040384   ;;  %v499_v0 = vmov 0.0   ;;  %vm500_vm1 = vmmov 0   ;;  %v501_v5 = vmov 0   ;;  %s646_s1 = inlined_call_operand.vmem [shape: bf16[33,128], index: 1, kind: input, shape index: {}]   ;;  %s647_s3 = inlined_call_operand.vmem [shape: bf16[128,64], index: 3, kind: input, shape index: {}]   ;;  %s648_s0 = inlined_call_operand.vmem [shape: bf16[8,33], index: 0, kind: input, shape index: {}]   ;;  %s649_s5 = inlined_call_operand.vmem [shape: bf16[64,32], index: 5, kind: input, shape index: {}]   ;;  %s650_s2 = inlined_call_operand.vmem [shape: f32[1,128], index: 2, kind: input, shape index: {}]   ;;  %s651_s7 = inlined_call_operand.vmem [shape: bf16[32,2], index: 7, kind: input, shape index: {}]   ;;  %s652_s4 = inlined_call_operand.vmem [shape: f32[1,64], index: 4, kind: input, shape index: {}]   ;;  %s653_s6 = inlined_call_operand.vmem [shape: f32[1,32], index: 6, kind: input, shape index: {}]   ;;  %s654_s8 = inlined_call_operand.vmem [shape: f32[1,2], index: 8, kind: input, shape index: {}]   ;;  %s655_s9 = inlined_call_operand.vmem [shape: f32[8,2], index: 9, kind: output, shape index: {}]  }
   0x1   :  { %429 = vmatprep.subr.bf16.mxu0 %v499_v0  ;;  %v482_v1 = vld [vmem:[%s646_s1] sm:$0xff]   ;;  %435 = vmatprep.mubr.msk.bf16.mxu0 %vm500_vm1, %v499_v0  ;;  %v483_v2 = vld [vmem:[%s646_s1 + $0x8] sm:$0xff]   ;;  %v484_v3 = vld [vmem:[%s646_s1 + $0x10] ss:$0 sps:$4 sm:$0x11]   ;;  %v67_v6 = vsel %vm65_vm0, 65535, %v501_v5 }
   0x2   :  { %439 = vmatprep.subr.bf16.mxu1 %v499_v0  ;;  %455 = vmatprep.mubr.msk.bf16.mxu1 %vm500_vm1, %v499_v0  ;;  %v485_v4 = vld [vmem:[%s647_s3] sm:$0xff]   ;;  %v486_v7 = vld [vmem:[%s647_s3 + $0x8] sm:$0xff]   ;;  %v69_v8 = vand.u32 %v484_v3, %v67_v6  ;;  %v487_v9 = vld [vmem:[%s647_s3 + $0x10] sm:$0xff]   ;;  %vm61_vm2 = vcmask 269312   ;;  %vm265_vm3 = vcmask 523264   ;;  %vm334_vm4 = vcmask 261120  }
   0x3   :  { %430 = vmatpush3.bf16.msra.mxu0 %v482_v1  ;;  %440 = vmatpush3.bf16.msra.mxu1 %v485_v4  ;;  %v33_v10 = vld [vmem:[%s648_s0] sm:$0xf]  ;;  %v488_v11 = vld [vmem:[%s647_s3 + $0x18] sm:$0xff]   ;;  %v490_v13 = vld [vmem:[%s647_s3 + $0x28] sm:$0xff]   ;;  %vm378_vm5 = vcmask 15360  }
   0x4   :  { %431 = vmatprep.subr.bf16.mxu0 %v499_v0  ;;  %441 = vmatprep.subr.bf16.mxu1 %v499_v0  ;;  %v489_v12 = vld [vmem:[%s647_s3 + $0x20] sm:$0xff]   ;;  %v491_v14 = vld [vmem:[%s647_s3 + $0x30] sm:$0xff]   ;;  %v492_v15 = vld [vmem:[%s647_s3 + $0x38] sm:$0xff]  }
   0x5   :  { %v493_v16 = vld [vmem:[%s649_s5] sm:$0xff]   ;;  %v494_v17 = vld [vmem:[%s649_s5 + $0x8] sm:$0xff]   ;;  %v495_v26 = vld [vmem:[%s649_s5 + $0x10] sm:$0xff]  }
   0x6   :  { %v384_v18 = vld [vmem:[%s650_s2] ss:$0 sm:$0xff]  ;;  %v496_v27 = vld [vmem:[%s649_s5 + $0x18] sm:$0xff]   ;;  %v498_v37 = vld [vmem:[%s651_s7 + $0x8] sm:$0xff]  }
   0x7   :  { %432 = vmatpush3.bf16.msra.mxu0 %v483_v2  ;;  %442 = vmatpush3.bf16.msra.mxu1 %v486_v7  ;;  %v389_v28 = vld [vmem:[%s652_s4] ss:$0 sm:$0xff] }
   0x8   :  { %433 = vmatprep.subr.bf16.mxu0 %v499_v0  ;;  %443 = vmatprep.subr.bf16.mxu1 %v499_v0  ;;  %v497_v35 = vld [vmem:[%s651_s7] sm:$0xff]  }
   0x9   :  { %v398_v38 = vld [vmem:[%s653_s6] ss:$0 sm:$0xff] }
   0xa   :  { %v404_v46 = vld [vmem:[%s654_s8] ss:$0 sm:$0xff] }
   0xb   :  { %434 = vmatpush3.bf16.msra.mxu0 %v69_v8  ;;  %444 = vmatpush3.bf16.msra.mxu1 %v487_v9 }
   0xc   :  { %459 = vmatprep.subr.bf16.mxu0 %v499_v0  ;;  %445 = vmatprep.subr.bf16.mxu1 %v499_v0 }
   0xe   :  { %436 = vmatmul.mubr.msk.bf16.vlgmr.msra.gmra.mrb[0].mxu0 %vm61_vm2, %v33_v10 }
   0xf   :  { %467 = vmatprep.mubr.msk.bf16.mxu0 %vm500_vm1, %v499_v0  ;;  %446 = vmatpush3.bf16.msra.mxu1 %v488_v11 }
  0x10   :  { %447 = vmatprep.subr.bf16.mxu1 %v499_v0  ;;  %460 = vmatpush3.bf16.msra.mxu0 %v493_v16 }
  0x11   :  { %461 = vmatprep.subr.bf16.mxu0 %v499_v0 }
  0x13   :  { %448 = vmatpush3.bf16.msra.mxu1 %v489_v12 }
  0x14   :  { %449 = vmatprep.subr.bf16.mxu1 %v499_v0  ;;  %462 = vmatpush3.bf16.msra.mxu0 %v494_v17 }
  0x15   :  { %463 = vmatprep.subr.bf16.mxu0 %v499_v0 }
  0x17   :  { %450 = vmatpush3.bf16.msra.mxu1 %v490_v13 }
  0x18   :  { %451 = vmatprep.subr.bf16.mxu1 %v499_v0  ;;  %464 = vmatpush3.bf16.msra.mxu0 %v495_v26 }
  0x19   :  { %465 = vmatprep.subr.bf16.mxu0 %v499_v0 }
  0x1b   :  { %452 = vmatpush3.bf16.msra.mxu1 %v491_v14 }
  0x1c   :  { %453 = vmatprep.subr.bf16.mxu1 %v499_v0  ;;  %466 = vmatpush3.bf16.msra.mxu0 %v496_v27 }
  0x1d   :  { %471 = vmatprep.subr.bf16.mxu0 %v499_v0 }
  0x1f   :  { %454 = vmatpush3.bf16.msra.mxu1 %v492_v15 }
  0xe1   :  { %v105_v19 = vpop.f32.mrb[0].mxu0 }
  0xe2   :  { %v106_v20 = vadd.f32 %v384_v18, %v105_v19  ;;  %v437_v21 = vpop.f32.mrb[1].mxu0 }
  0xe3   :  { %v108_v22 = vpop.f32.mrb[2].mxu0 }
  0xe4   :  { %v111_v23 = vmax.f32 %v106_v20, 0.0  ;;  %v438_v24 = vpop.f32.mrb[3].mxu0 }
  0xe6   :  { %v112_v25 = vpack.c.bf16 %v111_v23, %v111_v23 }
  0xe8   :  { %456 = vmatmul.mubr.bf16.vlgmr.msra.gmra.mrb[0].mxu1 %v112_v25 }
 0x1bb   :  { %v218_v29 = vpop.f32.mrb[0].mxu1 }
 0x1bc   :  { %v219_v30 = vadd.f32 %v389_v28, %v218_v29  ;;  %v457_v31 = vpop.f32.mrb[1].mxu1 }
 0x1bd   :  { %v221_v32 = vpop.f32.mrb[2].mxu1 }
 0x1be   :  { %v224_v33 = vmax.f32 %v219_v30, 0.0  ;;  %v458_v34 = vpop.f32.mrb[3].mxu1 }
 0x1c0   :  { %v225_v36 = vpack.c.bf16 %v224_v33, %v224_v33 }
 0x1c2   :  { %468 = vmatmul.mubr.msk.bf16.vlgmr.msra.gmra.mrb[4].mxu0 %vm265_vm3, %v225_v36 }
 0x1c3   :  { %472 = vmatpush3.bf16.msra.mxu0 %v497_v35  ;;  %475 = vmatprep.mubr.msk.bf16.mxu0 %vm500_vm1, %v499_v0 }
 0x1c4   :  { %473 = vmatprep.subr.bf16.mxu0 %v499_v0 }
 0x1c7   :  { %474 = vmatpush3.bf16.msra.mxu0 %v498_v37 }
 0x295   :  { %v303_v39 = vpop.f32.mrb[4].mxu0 }
 0x296   :  { %v304_v40 = vadd.f32 %v398_v38, %v303_v39  ;;  %v469_v41 = vpop.f32.mrb[5].mxu0 }
 0x297   :  { %v306_v42 = vpop.f32.mrb[6].mxu0 }
 0x298   :  { %v309_v43 = vmax.f32 %v304_v40, 0.0  ;;  %v470_v44 = vpop.f32.mrb[7].mxu0 }
 0x29a   :  { %v310_v45 = vpack.c.bf16 %v309_v43, %v309_v43 }
 0x29c   :  { %476 = vmatmul.mubr.msk.bf16.vlgmr.msra.gmra.mrb[8].mxu0 %vm334_vm4, %v310_v45 }
 0x36f   :  { %v372_v47 = vpop.f32.mrb[8].mxu0 }
 0x370   :  { %v373_v48 = vadd.f32 %v404_v46, %v372_v47  ;;  %v477_v49 = vpop.f32.mrb[9].mxu0 }
 0x371   :  { %v375_v50 = vpop.f32.mrb[10].mxu0 }
 0x372   :  { %379 = vst.msk [vmem:[%s655_s9] sm:$0xff] %vm378_vm5, %v373_v48  ;;  %v478_v51 = vpop.f32.mrb[11].mxu0 }

</bundles_post_ra>
